<compile_context>
chip_gen: v7x
topology: tpu7x:2x2x1
jax: 0.10.0
libtpu: 0.0.40
codegen_flags: <defaults>
</compile_context>

<pallas_src>
import functools

import jax
import jax.numpy as jnp
import numpy as np
from jax import lax
from jax.experimental import pallas as pl
from jax.experimental.pallas import tpu as pltpu


def _tv3d_edge_kernel(x_ref, l_ref, out_ref, *, W, inv_cd, inv_ch, inv_cw):
    """One grid step over TB (n, c) slices in lane-dense (TB, D, H*W) layout.

    Writes this block's per-lane partial sum (per-term 1/count already folded
    in) to out_ref (shape (1, 1, H*W)); the wrapper does the final cross-lane
    reduction and the 2/N scaling.
    """
    xv = x_ref[...]
    lv = l_ref[...]
    if xv.dtype != jnp.float32:          # cast only when needed (e.g. bf16 input)
        xv = xv.astype(jnp.float32)
    if lv.dtype != jnp.float32:
        lv = lv.astype(jnp.float32)

    tb, d, hw = xv.shape

    # ---- Hoisted boundary weights (applied AFTER the TB/D reductions). ----
    # W/H weights depend only on the lane index; the D weight only on the
    # sublane (depth) index, so they commute with the sums over TB (and D).
    lane = lax.broadcasted_iota(jnp.int32, (1, hw), 1)
    # valid where (p mod W) != W-1 (also kills the lane wrap-around position)
    wgt_w = jnp.where((lane % W) < (W - 1), jnp.float32(inv_cw), jnp.float32(0.0))
    # valid where p < (H-1)*W (also kills the wrap-around rows)
    wgt_h = jnp.where(lane < (hw - W), jnp.float32(inv_ch), jnp.float32(0.0))
    subl = lax.broadcasted_iota(jnp.int32, (d, 1), 0)
    # valid where depth index != D-1 (kills the sublane wrap-around plane)
    wgt_d = jnp.where(subl < (d - 1), jnp.float32(inv_cd), jnp.float32(0.0))

    # ---- W direction: neighbour is +1 along the fused lane axis (XLU roll). ----
    x_w = pltpu.roll(xv, shift=hw - 1, axis=2)   # x_w[..., p] = xv[..., (p + 1) % hw]
    l_w = pltpu.roll(lv, shift=hw - 1, axis=2)
    dxw = x_w - xv
    dlw = l_w - lv
    s_w = jnp.sum((dxw * dxw) * (1.0 - dlw * dlw), axis=0)      # (D, HW)

    # ---- H direction: neighbour is +W along the fused lane axis. ----
    x_h = pltpu.roll(xv, shift=hw - W, axis=2)   # x_h[..., p] = xv[..., (p + W) % hw]
    l_h = pltpu.roll(lv, shift=hw - W, axis=2)
    dxh = x_h - xv
    dlh = l_h - lv
    s_h = jnp.sum((dxh * dxh) * (1.0 - dlh * dlh), axis=0)      # (D, HW)

    # ---- D direction: neighbour is +1 along the depth (sublane) axis. ----
    x_d = pltpu.roll(xv, shift=d - 1, axis=1)    # x_d[:, s, :] = xv[:, (s + 1) % d, :]
    l_d = pltpu.roll(lv, shift=d - 1, axis=1)
    dxd = x_d - xv
    dld = l_d - lv
    s_d = jnp.sum((dxd * dxd) * (1.0 - dld * dld), axis=0)      # (D, HW)

    # Apply the hoisted weights to the small partials, reduce D, emit (1, HW).
    col = (jnp.sum(s_w, axis=0, keepdims=True) * wgt_w
           + jnp.sum(s_h, axis=0, keepdims=True) * wgt_h
           + jnp.sum(s_d * wgt_d, axis=0, keepdims=True))       # (1, HW)
    out_ref[...] = col.reshape(1, 1, hw)


def _pick_block(nc, slice_bytes, budget_bytes=2 << 20):
    """Per-grid-step (n,c)-slice count.

    Largest tb whose per-input block fits the ~2 MiB budget (f32-equivalent),
    capped at nc//2 so grid >= 2 and v7x megacore has something to shard.
    TODO(synk): when slice_bytes alone exceeds the budget, D-tiling is needed.
    """
    cap = nc if nc < 2 else max(1, nc // 2)
    fit = max(1, budget_bytes // max(1, slice_bytes))
    return int(max(1, min(cap, fit)))


def tv_loss_3d_edge(x, L, tv_loss_weight=1.0):
    """Pallas TPU implementation of TVLoss_3d_edge.forward.

    x, L: (N, C, D, H, W).  Assumes D, H, W > 1 (same degenerate-size caveat as
    the PyTorch original, which divides by a zero count).  bf16 inputs are
    accepted; arithmetic is done in f32 inside the kernel.
    """
    assert x.shape == L.shape, "x and L must have the same NCDHW shape"
    n, c, d, h, w = x.shape
    count_d = float(c * (d - 1) * h * w)
    count_h = float(c * d * (h - 1) * w)
    count_w = float(c * d * h * (w - 1))

    nc = n * c
    hw = h * w
    x_flat = x.reshape(nc, d, hw)     # lane-dense: fused H*W on the lane axis
    l_flat = L.reshape(nc, d, hw)

    # f32-equivalent accounting (in-kernel intermediates are f32 even for bf16 in).
    slice_bytes = d * hw * max(jnp.dtype(x.dtype).itemsize, 4)
    tb = _pick_block(nc, slice_bytes)

    # Zero-pad N*C to a multiple of tb: zero slices contribute exactly 0
    # (dx = dl = 0 within the slice; no cross-slice terms exist).
    nc_pad = pl.cdiv(nc, tb) * tb
    if nc_pad != nc:
        pad = nc_pad - nc
        x_flat = jnp.pad(x_flat, ((0, pad), (0, 0), (0, 0)))
        l_flat = jnp.pad(l_flat, ((0, pad), (0, 0), (0, 0)))
    grid = nc_pad // tb

    kernel = functools.partial(
        _tv3d_edge_kernel, W=w,
        inv_cd=1.0 / count_d, inv_ch=1.0 / count_h, inv_cw=1.0 / count_w)

    partials = pl.pallas_call(
        kernel,
        out_shape=jax.ShapeDtypeStruct((grid, 1, hw), jnp.float32),
        grid_spec=pltpu.PrefetchScalarGridSpec(
            num_scalar_prefetch=0,
            grid=(grid,),
            in_specs=[pl.BlockSpec((tb, d, hw), lambda i: (i, 0, 0)),
                      pl.BlockSpec((tb, d, hw), lambda i: (i, 0, 0))],
            out_specs=pl.BlockSpec((1, 1, hw), lambda i: (i, 0, 0)),
        ),
        compiler_params=pltpu.CompilerParams(
            dimension_semantics=("parallel",),   # independent blocks -> megacore OK
            vmem_limit_bytes=48 << 20),          # 2 in x 2 buf x 2 MiB + f32 temps
    )(x_flat, l_flat)

    total = jnp.sum(partials)                    # single cross-lane reduce, once
    return tv_loss_weight * 2.0 * total / n


def _tv_loss_3d_edge_ref(x, L, tv_loss_weight=1.0):
    """Pure-JAX reference mirroring the PyTorch forward exactly."""
    n, c, d, h, w = x.shape
    count_d = c * (d - 1) * h * w
    count_h = c * d * (h - 1) * w
    count_w = c * d * h * (w - 1)
    d_L = (L[:, :, 1:, :, :] - L[:, :, :-1, :, :]) ** 2
    h_L = (L[:, :, :, 1:, :] - L[:, :, :, :-1, :]) ** 2
    w_L = (L[:, :, :, :, 1:] - L[:, :, :, :, :-1]) ** 2
    d_t = (x[:, :, 1:, :, :] - x[:, :, :-1, :, :]) ** 2
    h_t = (x[:, :, :, 1:, :] - x[:, :, :, :-1, :]) ** 2
    w_t = (x[:, :, :, :, 1:] - x[:, :, :, :, :-1]) ** 2
    d_tv = jnp.sum(d_t * (1.0 - d_L))
    h_tv = jnp.sum(h_t * (1.0 - h_L))
    w_tv = jnp.sum(w_t * (1.0 - w_L))
    return tv_loss_weight * 2.0 * (d_tv / count_d + h_tv / count_h + w_tv / count_w) / n


if __name__ == "__main__":
    key = jax.random.PRNGKey(0)
    kx, kl = jax.random.split(key)
    # Small deterministic inputs: (N=2, C=4, D=8, H=16, W=16), NCDHW layout.
    shape = (2, 4, 8, 16, 16)
    x = jax.random.normal(kx, shape, dtype=jnp.float32)
    L = jax.random.normal(kl, shape, dtype=jnp.float32)

    out = tv_loss_3d_edge(x, L, tv_loss_weight=1.0)
    out = jax.block_until_ready(out)

    ref = _tv_loss_3d_edge_ref(x, L, tv_loss_weight=1.0)
    ref = jax.block_until_ready(ref)

    np.testing.assert_allclose(np.asarray(out), np.asarray(ref), rtol=1e-4, atol=1e-5)
    print("KERNEL_OK")
</pallas_src>

<mosaic_0001>
module attributes {stable_mosaic.version = 11 : i64} {
  func.func @_tv3d_edge_kernel(%arg0: i32, %arg1: memref<4x8x256xf32, #tpu.memory_space<vmem>>, %arg2: memref<4x8x256xf32, #tpu.memory_space<vmem>>, %arg3: memref<1x1x256xf32, #tpu.memory_space<vmem>>) attributes {dimension_semantics = [#tpu.dimension_semantics<parallel>], iteration_bounds = array<i64: 2>, scalar_prefetch = 0 : i64, scratch_operands = 0 : i64, tpu.core_type = #tpu.core_type<tc>, window_params = [{transform_indices = @transform_0, window_bounds = array<i64: 4, 8, 256>}, {transform_indices = @transform_1, window_bounds = array<i64: 4, 8, 256>}, {transform_indices = @transform_2, window_bounds = array<i64: 1, 1, 256>}]} {
    %c0 = arith.constant 0 : index
    %c0_0 = arith.constant 0 : index
    %c0_1 = arith.constant 0 : index
    %0 = vector.load %arg1[%c0, %c0_0, %c0_1] : memref<4x8x256xf32, #tpu.memory_space<vmem>>, vector<4x8x256xf32>
    %c0_2 = arith.constant 0 : index
    %c0_3 = arith.constant 0 : index
    %c0_4 = arith.constant 0 : index
    %1 = vector.load %arg2[%c0_2, %c0_3, %c0_4] : memref<4x8x256xf32, #tpu.memory_space<vmem>>, vector<4x8x256xf32>
    %2 = tpu.iota {dimensions = array<i32: 1>} : vector<1x256xi32>
    %c16_i32 = arith.constant 16 : i32
    %c0_i32 = arith.constant 0 : i32
    %3 = arith.cmpi eq, %c16_i32, %c0_i32 : i32
    %c1_i32 = arith.constant 1 : i32
    %4 = arith.select %3, %c1_i32, %c16_i32 : i32
    %5 = vector.broadcast %4 : i32 to vector<1x256xi32>
    %6 = arith.remsi %2, %5 : vector<1x256xi32>
    %c0_i32_5 = arith.constant 0 : i32
    %7 = vector.broadcast %c0_i32_5 : i32 to vector<1x256xi32>
    %8 = arith.cmpi ne, %6, %7 : vector<1x256xi32>
    %c0_i32_6 = arith.constant 0 : i32
    %9 = vector.broadcast %c0_i32_6 : i32 to vector<1x256xi32>
    %10 = arith.cmpi slt, %6, %9 : vector<1x256xi32>
    %c0_i32_7 = arith.constant 0 : i32
    %11 = arith.cmpi slt, %4, %c0_i32_7 : i32
    %12 = vector.broadcast %11 : i1 to vector<1x256xi1>
    %13 = vector.broadcast %12 : vector<1x256xi1> to vector<1x256xi1>
    %14 = arith.xori %10, %13 : vector<1x256xi1>
    %15 = arith.andi %14, %8 : vector<1x256xi1>
    %16 = vector.broadcast %4 : i32 to vector<1x256xi32>
    %17 = arith.addi %6, %16 : vector<1x256xi32>
    %18 = arith.select %15, %17, %6 : vector<1x256xi1>, vector<1x256xi32>
    %c15_i32 = arith.constant 15 : i32
    %19 = vector.broadcast %c15_i32 : i32 to vector<1x256xi32>
    %20 = arith.cmpi slt, %18, %19 : vector<1x256xi32>
    %cst = arith.constant 1.3020834E-4 : f32
    %cst_8 = arith.constant 0.000000e+00 : f32
    %21 = vector.broadcast %cst : f32 to vector<1x256xf32>
    %22 = vector.broadcast %cst_8 : f32 to vector<1x256xf32>
    %23 = arith.select %20, %21, %22 : vector<1x256xi1>, vector<1x256xf32>
    %c240_i32 = arith.constant 240 : i32
    %24 = vector.broadcast %c240_i32 : i32 to vector<1x256xi32>
    %25 = arith.cmpi slt, %2, %24 : vector<1x256xi32>
    %cst_9 = arith.constant 1.3020834E-4 : f32
    %cst_10 = arith.constant 0.000000e+00 : f32
    %26 = vector.broadcast %cst_9 : f32 to vector<1x256xf32>
    %27 = vector.broadcast %cst_10 : f32 to vector<1x256xf32>
    %28 = arith.select %25, %26, %27 : vector<1x256xi1>, vector<1x256xf32>
    %29 = tpu.iota {dimensions = array<i32: 0>} : vector<8x1xi32>
    %c7_i32 = arith.constant 7 : i32
    %30 = vector.broadcast %c7_i32 : i32 to vector<8x1xi32>
    %31 = arith.cmpi slt, %29, %30 : vector<8x1xi32>
    %cst_11 = arith.constant 1.39508935E-4 : f32
    %cst_12 = arith.constant 0.000000e+00 : f32
    %32 = vector.broadcast %cst_11 : f32 to vector<8x1xf32>
    %33 = vector.broadcast %cst_12 : f32 to vector<8x1xf32>
    %34 = arith.select %31, %32, %33 : vector<8x1xi1>, vector<8x1xf32>
    %c255_i32 = arith.constant 255 : i32
    %35 = tpu.dynamic_rotate %0 by %c255_i32 dim 2 : vector<4x8x256xf32>, i32 -> vector<4x8x256xf32>
    %c255_i32_13 = arith.constant 255 : i32
    %36 = tpu.dynamic_rotate %1 by %c255_i32_13 dim 2 : vector<4x8x256xf32>, i32 -> vector<4x8x256xf32>
    %37 = arith.subf %35, %0 : vector<4x8x256xf32>
    %38 = arith.subf %36, %1 : vector<4x8x256xf32>
    %39 = arith.mulf %37, %37 : vector<4x8x256xf32>
    %40 = arith.mulf %38, %38 : vector<4x8x256xf32>
    %cst_14 = arith.constant 1.000000e+00 : f32
    %41 = vector.broadcast %cst_14 : f32 to vector<4x8x256xf32>
    %42 = arith.subf %41, %40 : vector<4x8x256xf32>
    %43 = arith.mulf %39, %42 : vector<4x8x256xf32>
    %cst_15 = arith.constant dense<0.000000e+00> : vector<8x256xf32>
    %44 = vector.multi_reduction <add>, %43, %cst_15 [0] : vector<4x8x256xf32> to vector<8x256xf32>
    %c240_i32_16 = arith.constant 240 : i32
    %45 = tpu.dynamic_rotate %0 by %c240_i32_16 dim 2 : vector<4x8x256xf32>, i32 -> vector<4x8x256xf32>
    %c240_i32_17 = arith.constant 240 : i32
    %46 = tpu.dynamic_rotate %1 by %c240_i32_17 dim 2 : vector<4x8x256xf32>, i32 -> vector<4x8x256xf32>
    %47 = arith.subf %45, %0 : vector<4x8x256xf32>
    %48 = arith.subf %46, %1 : vector<4x8x256xf32>
    %49 = arith.mulf %47, %47 : vector<4x8x256xf32>
    %50 = arith.mulf %48, %48 : vector<4x8x256xf32>
    %cst_18 = arith.constant 1.000000e+00 : f32
    %51 = vector.broadcast %cst_18 : f32 to vector<4x8x256xf32>
    %52 = arith.subf %51, %50 : vector<4x8x256xf32>
    %53 = arith.mulf %49, %52 : vector<4x8x256xf32>
    %cst_19 = arith.constant dense<0.000000e+00> : vector<8x256xf32>
    %54 = vector.multi_reduction <add>, %53, %cst_19 [0] : vector<4x8x256xf32> to vector<8x256xf32>
    %c7_i32_20 = arith.constant 7 : i32
    %55 = tpu.dynamic_rotate %0 by %c7_i32_20 dim 1 : vector<4x8x256xf32>, i32 -> vector<4x8x256xf32>
    %c7_i32_21 = arith.constant 7 : i32
    %56 = tpu.dynamic_rotate %1 by %c7_i32_21 dim 1 : vector<4x8x256xf32>, i32 -> vector<4x8x256xf32>
    %57 = arith.subf %55, %0 : vector<4x8x256xf32>
    %58 = arith.subf %56, %1 : vector<4x8x256xf32>
    %59 = arith.mulf %57, %57 : vector<4x8x256xf32>
    %60 = arith.mulf %58, %58 : vector<4x8x256xf32>
    %cst_22 = arith.constant 1.000000e+00 : f32
    %61 = vector.broadcast %cst_22 : f32 to vector<4x8x256xf32>
    %62 = arith.subf %61, %60 : vector<4x8x256xf32>
    %63 = arith.mulf %59, %62 : vector<4x8x256xf32>
    %cst_23 = arith.constant dense<0.000000e+00> : vector<8x256xf32>
    %64 = vector.multi_reduction <add>, %63, %cst_23 [0] : vector<4x8x256xf32> to vector<8x256xf32>
    %cst_24 = arith.constant dense<0.000000e+00> : vector<256xf32>
    %65 = vector.multi_reduction <add>, %44, %cst_24 [0] : vector<8x256xf32> to vector<256xf32>
    %66 = vector.shape_cast %65 : vector<256xf32> to vector<1x256xf32>
    %67 = arith.mulf %66, %23 : vector<1x256xf32>
    %cst_25 = arith.constant dense<0.000000e+00> : vector<256xf32>
    %68 = vector.multi_reduction <add>, %54, %cst_25 [0] : vector<8x256xf32> to vector<256xf32>
    %69 = vector.shape_cast %68 : vector<256xf32> to vector<1x256xf32>
    %70 = arith.mulf %69, %28 : vector<1x256xf32>
    %71 = arith.addf %67, %70 : vector<1x256xf32>
    %72 = vector.broadcast %34 : vector<8x1xf32> to vector<8x256xf32>
    %73 = arith.mulf %64, %72 : vector<8x256xf32>
    %cst_26 = arith.constant dense<0.000000e+00> : vector<256xf32>
    %74 = vector.multi_reduction <add>, %73, %cst_26 [0] : vector<8x256xf32> to vector<256xf32>
    %75 = vector.shape_cast %74 : vector<256xf32> to vector<1x256xf32>
    %76 = arith.addf %71, %75 : vector<1x256xf32>
    %77 = vector.shape_cast %76 : vector<1x256xf32> to vector<1x1x256xf32>
    %c0_27 = arith.constant 0 : index
    %c0_28 = arith.constant 0 : index
    %c0_29 = arith.constant 0 : index
    %78 = vector.load %arg3[%c0_27, %c0_28, %c0_29] : memref<1x1x256xf32, #tpu.memory_space<vmem>>, vector<1x1x256xf32>
    tpu.vector_store %arg3[%c0_27, %c0_28, %c0_29], %77 {strides = array<i32>} : memref<1x1x256xf32, #tpu.memory_space<vmem>>, vector<1x1x256xf32>,
    return
  }
  func.func @transform_0(%arg0: i32) -> (i32, i32, i32) {
    %c0_i32 = arith.constant 0 : i32
    %c0_i32_0 = arith.constant 0 : i32
    %c0_i32_1 = arith.constant 0 : i32
    return %arg0, %c0_i32, %c0_i32_0 : i32, i32, i32
  }
  func.func @transform_1(%arg0: i32) -> (i32, i32, i32) {
    %c0_i32 = arith.constant 0 : i32
    %c0_i32_0 = arith.constant 0 : i32
    %c0_i32_1 = arith.constant 0 : i32
    return %arg0, %c0_i32, %c0_i32_0 : i32, i32, i32
  }
  func.func @transform_2(%arg0: i32) -> (i32, i32, i32) {
    %c0_i32 = arith.constant 0 : i32
    %c0_i32_0 = arith.constant 0 : i32
    %c0_i32_1 = arith.constant 0 : i32
    return %arg0, %c0_i32, %c0_i32_0 : i32, i32, i32
  }
}

</mosaic_0001>

<bundles_post_ra>
// kernel: tpu_custom_call.1
= control target key start
LH: loop header
LB: loop body
LE: loop exit
PB: predicated region body
PF: predicated region fallthrough
CT: control target
= control target key end

     0   :  { %7 = vsyncpa [#allocation3], 0  ;;  %s1491_s0 = inlined_call_operand.hbm [shape: f32[8,8,256], index: 0, kind: input, shape index: {}]   ;;  %s1492_s1 = inlined_call_operand.hbm [shape: f32[8,8,256], index: 1, kind: input, shape index: {}]   ;;  %s1493_s2 = inlined_call_operand.hbm [shape: f32[2,1,256], index: 2, kind: output, shape index: {}]  }
   0x1   :  { %9 = vsyncpa [#allocation3 + $0x1], 0 }
   0x2   :  { %10 = vsyncpa [#allocation6], 0 }
   0x3   :  { %12 = vsyncpa [#allocation6 + $0x1], 0 }
   0x4   :  { %13 = vsyncpa [#allocation4], 0 }
   0x5   :  { %15 = vsyncpa [#allocation4 + $0x1], 0  ;;  %s952_s9 = smov 0   ;;  %s954_s10 = smov 0  }
   0x6   :  { %s956_s11 = smov 0   ;;  %s958_s12 = smov 0  }
   0x7 LB: > { %s973_s13 = sadd.s32 4294967295, %s926_s12   ;;  %s714_s14 = sadd.s32 4294967294, %s926_s12   ;;  %s926_s12 = sphi %s958_s12, %s1509_s12   ;;  %s922_s11 = sphi %s956_s11, %s1508_s11   ;;  %s918_s10 = sphi %s954_s10, %s1507_s10   ;;  %s914_s9 = sphi %s952_s9, %s1506_s9  }
   0x8   : > { %s977_s15 = sadd.s32 1, %s926_s12   ;;  %s28_s16 = sadd.s32 1, %s922_s11 }
   0x9   : > { %s25_s17 = ssub.s32 %s926_s12, %s977_s15  ;;  %p35_p0 = scmp.ne.s32.totalorder %s922_s11, %s918_s10 }
   0xa   : > { %p26_p1 = scmp.eq.s32.totalorder %s25_s17, 0  ;;  %p36_p2 = scmp.eq.s32.totalorder %s926_s12, 0 }
   0xb   : > { %p41_p3 = scmp.ne.s32.totalorder %s918_s10, %s914_s9  ;;  %p42_p4 = scmp.eq.s32.totalorder %s973_s13, 0 }
   0xc   : > { %s989_s18 = scalar_select %p26_p1, %s922_s11, %s28_s16  }
   0xd   : > { %p991_p5 = por %p36_p2, %p35_p0  ;;  %p995_p6 = por %p42_p4, %p41_p3 }
   0xe   : > { %p91_p7 = scmp.eq.s32.totalorder %s973_s13, 1  ;;  %p97_p8 = scmp.eq.s32.totalorder %s714_s14, 1 }
   0xf   : > { %s1497_s20 = scalar_select %p995_p6, 1, 0 }
  0x10   : > { %p756_p10 = scmp.lt.s32.totalorder %s926_s12, 2  ;;  %p1002_p11 = por %p91_p7, %p35_p0 }
  0x11   : > { %p1006_p12 = por %p97_p8, %p41_p3  ;;  %s1011_s23 = sand.u32 1, %s922_s11  }
  0x12   : > { %s1498_s21 = scalar_select %p1002_p11, 1, 0 }
  0x13   : > { %s1499_s22 = scalar_select %p1006_p12, 1, 0 }
  0x14   : > { %s735_s24 = sshll.u32 %s926_s12, 10  ;;  %s717_s25 = sshll.u32 %s1011_s23, 6 }
  0x15   : > { %s1020_s28 = scalar_lea.hbm %s1491_s0, %s735_s24  ;;  %s121_s29 = scalar_lea.vmem [#allocation2], %s717_s25 }
  0x16   : > { %s129_s30 = sshll.u32 %s121_s29, 4  ;;  %p1026_p13 = pnand %p756_p10, %p991_p5  ;;  %s1030_s30 = int_to_ptr.vmem [resolvable:$true] %s129_s30 }
  0x17   : > { %s118_s4 = scalar_lea.sflag [#allocation3], %s1011_s23  ;;  %s796_s5 = scalar_lea.hbm %s1020_s28, 1024 }
  0x18   : > { %p797_p0 = scmp.ne.s32.totalorder %s1020_s28, %s796_s5  ;;  %p798_p1 = pneg %p1026_p13 }
  0x19   : > { %s801_s8 = scalar_lea.hbm %s1491_s0, 2048  ;;  %p802_p4 = scmp.lt.u32.totalorder %s1020_s28, %s1491_s0 }
  0x1a   : > { %p799_p2 = pnand %p798_p1, %p797_p0  ;;  %p803_p5 = scmp.lt.u32.totalorder %s801_s8, %s796_s5 }
  0x1b   : > { %p805_p8 = scmp.lt.u32.totalorder %s796_s5, %s1020_s28 }
  0x1c   : > { %p800_p3 = pneg %p799_p2  ;;  %p804_p7 = por %p803_p5, %p802_p4 }
  0x1e   : > { %p806_p10 = por %p805_p8, %p804_p7 }
  0x20   : > { %p807_p9 = pnand %p806_p10, %p800_p3 }
  0x22   : > { %810 = shalt.err (!%p807_p9)
}
  0x23   : > { %s811_s17 = scalar_lea.vmem %s1030_s30, 1024  ;;  %s928_s19 = smov [#allocation2]  }
  0x24   : > { %p812_p0 = scmp.ne.s32.totalorder %s1030_s30, %s811_s17  ;;  %s816_s26 = sshll.u32 %s928_s19, 4  ;;  %s817_s26 = int_to_ptr.vmem [resolvable:$false] %s816_s26 }
  0x25   : > { %s818_s27 = scalar_lea.vmem %s817_s26, 2048  ;;  %p819_p11 = scmp.lt.s32.totalorder %s1030_s30, %s817_s26 }
  0x26   : > { %p814_p2 = pnand %p812_p0, %p798_p1  ;;  %p820_p4 = scmp.lt.s32.totalorder %s818_s27, %s811_s17 }
  0x28   : > { %p815_p12 = pneg %p814_p2  ;;  %p821_p5 = por %p820_p4, %p819_p11 }
  0x2a   : > { %p822_p7 = pnand %p821_p5, %p815_p12 }
  0x2c   : > { %825 = shalt.err (!%p822_p7)
}
  0x2d   : > { %s929_s29 = smov 256   ;;  %s930_s5 = smov 16  }
  0x2e   : > { %748 = dma.hbm_to_vmem [thread:$0]  (!%p1026_p13), %s1020_s28, 1024, %s1030_s30, %s118_s4, %s929_s29, %s929_s29, %s930_s5  }
  0x2f   : > { %p725_p9 = scmp.ge.s32.totalorder %s926_s12, 1  ;;  %p159_p11 = scmp.lt.s32.totalorder %s926_s12, 3 }
  0x30   : > { %s1074_s14 = scalar_lea.hbm %s1492_s1, %s735_s24  ;;  %s143_s16 = scalar_lea.vmem [#allocation5], %s717_s25 }
  0x31   : > { %p1065_p12 = pnand %p725_p9, %p159_p11  ;;  %s151_s17 = sshll.u32 %s143_s16, 4  ;;  %s1078_s17 = int_to_ptr.vmem [resolvable:$true] %s151_s17 }
  0x32   : > { %s140_s28 = scalar_lea.sflag [#allocation6], %s1011_s23  ;;  %s826_s30 = scalar_lea.hbm %s1074_s14, 1024 }
  0x33   : > { %p827_p3 = scmp.ne.s32.totalorder %s1074_s14, %s826_s30  ;;  %s831_s24 = scalar_lea.hbm %s1492_s1, 2048 }
  0x34   : > { %p832_p0 = scmp.lt.u32.totalorder %s1074_s14, %s1492_s1  ;;  %p833_p2 = scmp.lt.u32.totalorder %s831_s24, %s826_s30 }
  0x35   : > { %p829_p8 = pnand %p827_p3, %p798_p1  ;;  %p835_p5 = scmp.lt.u32.totalorder %s826_s30, %s1074_s14 }
  0x36   : > { %p834_p4 = por %p833_p2, %p832_p0 }
  0x37   : > { %p830_p10 = pneg %p829_p8 }
  0x38   : > { %p836_p7 = por %p835_p5, %p834_p4 }
  0x3a   : > { %p837_p9 = pnand %p836_p7, %p830_p10 }
  0x3c   : > { %840 = shalt.err (!%p837_p9)
}
  0x3d   : > { %s841_s25 = scalar_lea.vmem %s1078_s17, 1024  ;;  %s931_s7 = smov [#allocation5]  }
  0x3e   : > { %p842_p11 = scmp.ne.s32.totalorder %s1078_s17, %s841_s25  ;;  %s846_s8 = sshll.u32 %s931_s7, 4  ;;  %s847_s8 = int_to_ptr.vmem [resolvable:$false] %s846_s8 }
  0x3f   : > { %s848_s16 = scalar_lea.vmem %s847_s8, 2048  ;;  %p849_p6 = scmp.lt.s32.totalorder %s1078_s17, %s847_s8 }
  0x40   : > { %p844_p3 = pnand %p842_p11, %p798_p1  ;;  %p850_p0 = scmp.lt.s32.totalorder %s848_s16, %s841_s25 }
  0x42   : > { %p845_p8 = pneg %p844_p3  ;;  %p851_p2 = por %p850_p0, %p849_p6 }
  0x44   : > { %p852_p4 = pnand %p851_p2, %p845_p8 }
  0x46   : > { %855 = shalt.err (!%p852_p4)
}
  0x47   : > { %751 = dma.hbm_to_vmem [thread:$0]  (!%p1026_p13), %s1074_s14, 1024, %s1078_s17, %s140_s28, %s929_s29, %s929_s29, %s930_s5  }
  0x48   : > { %163 = sbr.rel (%p1065_p12) target bundleno = 305 (0x131), region = 28  ;;  %s1112_s30 = sand.u32 (!%p1065_p12), 1, %s918_s10  }
  0x49   : > { %s726_s4 = sshll.u32 (!%p1065_p12), %s1112_s30, 6  ;;  %s166_s19 = scalar_lea.sflag (!%p1065_p12), [#allocation3], %s1112_s30 }
  0x4a   : > { %s1116_s3 = scalar_lea.vmem (!%p1065_p12), [#allocation2], %s726_s4  ;;  %p1502_p6 = scmp.ne.s32.totalorder (!%p1065_p12), %s1497_s20, 0 }
  0x4f   : > { %901 = dma.done.wait (%p1502_p6), %s166_s19, 1024  }
  0x50   : > { %903 = vsyncadd (%p1502_p6), %s166_s19, 4294966272  ;;  %s175_s23 = scalar_lea.sflag [#allocation6], %s1112_s30  ;;  %s1123_s29 = scalar_lea.vmem [#allocation5], %s726_s4 }
  0x51   : > { %905 = dma.done.wait (%p1502_p6), %s175_s23, 1024  }
  0x52   : > { %907 = vsyncadd (%p1502_p6), %s175_s23, 4294966272  ;;  %v1130_v0 = vld [vmem:[%s1123_s29 + $0x8] sm:$0xff]  ;;  %v1133_v1 = vld [vmem:[%s1123_s29] sm:$0xff]  ;;  %s932_s5 = smov 127   ;;  %s933_s20 = smov 112  }
  0x53   : > { %294 = vrot.lane.b32.xlu1 %v1130_v0, %s932_s5  ;;  %286 = vrot.lane.b32.xlu0 %v1133_v1, %s932_s5  ;;  %v1140_v2 = vld [vmem:[%s1123_s29 + $0x18] sm:$0xff]  ;;  %v1143_v3 = vld [vmem:[%s1123_s29 + $0x10] sm:$0xff]  ;;  %v476_v16 = vrot.slane %v1130_v0, 1  ;;  %v475_v17 = vrot.slane %v1133_v1, 1  ;;  %s728_s6 = sshll.u32 %s1112_s30, 1  ;;  %s738_s14 = sshll.u32 %s973_s13, 5 }
  0x54   : > { %v1158_v4 = vld [vmem:[%s1116_s3 + $0x10] sm:$0xff]  ;;  %v1161_v5 = vld [vmem:[%s1116_s3] sm:$0xff]  ;;  %v1168_v6 = vld [vmem:[%s1116_s3 + $0x18] sm:$0xff]  ;;  %v478_v18 = vrot.slane %v1140_v2, 1  ;;  %v477_v19 = vrot.slane %v1143_v3, 1  ;;  %s203_s17 = scalar_lea.vmem [#allocation7], %s728_s6  ;;  %s1447_s27 = scalar_lea.hbm %s1493_s2, %s738_s14 }
  0x55   : > { %v1171_v7 = vld [vmem:[%s1116_s3 + $0x8] sm:$0xff]  ;;  %v1181_v9 = vld [vmem:[%s1123_s29 + $0x20] sm:$0xff]  ;;  %v1210_v12 = vld [vmem:[%s1123_s29 + $0x38] sm:$0xff]  ;;  %v492_v20 = vsub.f32 %v476_v16, %v1130_v0  ;;  %v491_v21 = vsub.f32 %v475_v17, %v1133_v1  ;;  %v469_v23 = vrot.slane %v1158_v4, 1  ;;  %v467_v27 = vrot.slane %v1161_v5, 1  ;;  %s621_s28 = sshll.u32 %s203_s17, 4  ;;  %s1449_s28 = int_to_ptr.vmem [resolvable:$true] %s621_s28 }
  0x56   : > { %v1178_v8 = vld [vmem:[%s1123_s29 + $0x28] sm:$0xff]  ;;  %v1203_v11 = vld [vmem:[%s1116_s3 + $0x20] sm:$0xff]  ;;  %v1213_v13 = vld [vmem:[%s1123_s29 + $0x30] sm:$0xff]  ;;  %v494_v22 = vsub.f32 %v478_v18, %v1140_v2  ;;  %v493_v26 = vsub.f32 %v477_v19, %v1143_v3  ;;  %v470_v28 = vrot.slane %v1168_v6, 1  ;;  %v468_v29 = vrot.slane %v1171_v7, 1  ;;  %s607_s25 = scalar_lea.sflag [#allocation4], %s1112_s30 }
  0x57   : > { %296 = vrot.lane.b32.xlu1 %v1140_v2, %s932_s5  ;;  %288 = vrot.lane.b32.xlu0 %v1143_v3, %s932_s5  ;;  %v1200_v10 = vld [vmem:[%s1116_s3 + $0x28] sm:$0xff]  ;;  %v1228_v14 = vld [vmem:[%s1116_s3 + $0x38] sm:$0xff]  ;;  %v480_v30 = vrot.slane %v1178_v8, 1  ;;  %v479_v31 = vrot.slane %v1181_v9, 1  ;;  %v508_v32 = vmul.f32 %v492_v20, %v492_v20  ;;  %v507_v33 = vmul.f32 %v491_v21, %v491_v21  ;;  %s856_s7 = scalar_lea.vmem %s1449_s28, 32  ;;  %p1503_p1 = scmp.ne.s32.totalorder %s1498_s21, 0 }
  0x58   : > { %v1231_v15 = vld [vmem:[%s1116_s3 + $0x30] sm:$0xff]  ;;  %v510_v34 = vmul.f32 %v494_v22, %v494_v22  ;;  %v485_v35 = vsub.f32 %v469_v23, %v1158_v4  ;;  %v509_v38 = vmul.f32 %v493_v26, %v493_v26  ;;  %v483_v39 = vsub.f32 %v467_v27, %v1161_v5  ;;  %p857_p13 = scmp.ne.s32.totalorder %s1449_s28, %s856_s7  ;;  %s936_s13 = smov [#allocation7]  }
  0x59   : > { %v486_v40 = vsub.f32 %v470_v28, %v1168_v6  ;;  %v484_v41 = vsub.f32 %v468_v29, %v1171_v7  ;;  %v496_v42 = vsub.f32 %v480_v30, %v1178_v8  ;;  %v495_v43 = vsub.f32 %v479_v31, %v1181_v9  ;;  %s860_s8 = sshll.u32 %s936_s13, 4  ;;  %s861_s8 = int_to_ptr.vmem [resolvable:$false] %s860_s8 }
  0x5a   : > { %v472_v44 = vrot.slane %v1200_v10, 1  ;;  %v471_v45 = vrot.slane %v1203_v11, 1  ;;  %v482_v46 = vrot.slane %v1210_v12, 1  ;;  %v481_v47 = vrot.slane %v1213_v13, 1  ;;  %p858_p12 = pnand %p857_p13, %p1503_p1  ;;  %s862_s16 = scalar_lea.vmem %s861_s8, 64 }
  0x5b   : > { %391 = vrot.lane.b32.xlu1 %v1143_v3, %s933_s20  ;;  %389 = vrot.lane.b32.xlu0 %v1133_v1, %s933_s20  ;;  %v516_v48 = vsub.f32 1.0, %v508_v32  ;;  %v515_v49 = vsub.f32 1.0, %v507_v33  ;;  %v518_v50 = vsub.f32 1.0, %v510_v34  ;;  %v501_v51 = vmul.f32 %v485_v35, %v485_v35  ;;  %p863_p5 = scmp.lt.s32.totalorder %s1449_s28, %s861_s8  ;;  %p864_p7 = scmp.lt.s32.totalorder %s862_s16, %s856_s7 }
  0x5c   : > { %v517_v54 = vsub.f32 1.0, %v509_v38  ;;  %v499_v55 = vmul.f32 %v483_v39, %v483_v39  ;;  %v502_v56 = vmul.f32 %v486_v40, %v486_v40  ;;  %v500_v57 = vmul.f32 %v484_v41, %v484_v41  ;;  %p859_p10 = pneg %p858_p12 }
  0x5d   : > { %v512_v58 = vmul.f32 %v496_v42, %v496_v42  ;;  %v511_v59 = vmul.f32 %v495_v43, %v495_v43  ;;  %v488_v60 = vsub.f32 %v472_v44, %v1200_v10  ;;  %v487_v61 = vsub.f32 %v471_v45, %v1203_v11  ;;  %p865_p9 = por %p864_p7, %p863_p5 }
  0x5e   : > { %v498_v62 = vsub.f32 %v482_v46, %v1210_v12  ;;  %v497_v63 = vsub.f32 %v481_v47, %v1213_v13  ;;  %v474_v16 = vrot.slane %v1228_v14, 1  ;;  %v473_v17 = vrot.slane %v1231_v15, 1 }
  0x5f   : > { %399 = vrot.lane.b32.xlu1 %v1140_v2, %s933_s20  ;;  %397 = vrot.lane.b32.xlu0 %v1130_v0, %s933_s20  ;;  %v525_v20 = vmul.f32 %v517_v54, %v501_v51  ;;  %v523_v21 = vmul.f32 %v515_v49, %v499_v55  ;;  %v526_v22 = vmul.f32 %v518_v50, %v502_v56  ;;  %v520_v26 = vsub.f32 1.0, %v512_v58  ;;  %p866_p11 = pnand %p865_p9, %p859_p10 }
  0x60   : > { %v524_v23 = vmul.f32 %v516_v48, %v500_v57  ;;  %v519_v27 = vsub.f32 1.0, %v511_v59  ;;  %v504_v28 = vmul.f32 %v488_v60, %v488_v60  ;;  %v503_v29 = vmul.f32 %v487_v61, %v487_v61 }
  0x61   : > { %v514_v30 = vmul.f32 %v498_v62, %v498_v62  ;;  %v513_v31 = vmul.f32 %v497_v63, %v497_v63  ;;  %v490_v32 = vsub.f32 %v474_v16, %v1228_v14  ;;  %v489_v33 = vsub.f32 %v473_v17, %v1231_v15 }
  0x62   : > { %v222_v38 = vlaneseq  ;;  %v531_v39 = vadd.f32 %v525_v20, %v523_v21  ;;  %v534_v40 = vadd.f32 %v526_v22, %v524_v23  ;;  %v528_v41 = vmul.f32 %v520_v26, %v504_v28 }
  0x63   : > { %263 = vrot.lane.b32.xlu1 %v1158_v4, %s932_s5  ;;  %261 = vrot.lane.b32.xlu0 %v1161_v5, %s932_s5  ;;  %v527_v42 = vmul.f32 %v519_v27, %v503_v29  ;;  %v522_v43 = vsub.f32 1.0, %v514_v30  ;;  %v521_v44 = vsub.f32 1.0, %v513_v31  ;;  %v506_v45 = vmul.f32 %v490_v32, %v490_v32 }
  0x64   : > { %v505_v46 = vmul.f32 %v489_v33, %v489_v33  ;;  %v1288_v49 = vshrl.u32 %v222_v38, 7  ;;  %v1291_v50 = vand.u32 127, %v222_v38  ;;  %v535_v51 = vadd.f32 %v534_v40, %v528_v41 }
  0x65   : > { %v532_v54 = vadd.f32 %v531_v39, %v527_v42  ;;  %v530_v55 = vmul.f32 %v522_v43, %v506_v45  ;;  %v934_v63 = vmov 0.0   ;;  %vm603_vm6 = vcmp.lt.s32.totalorder %v222_v38, 256 }
  0x66   : > { %v529_v56 = vmul.f32 %v521_v44, %v505_v46  ;;  %vm259_vm0 = vcmp.lt.s32.totalorder %v1288_v49, 7  ;;  %vm277_vm1 = vcmp.lt.s32.totalorder %v1291_v50, 127  ;;  %vm380_vm2 = vcmp.lt.s32.totalorder %v1291_v50, 112 }
  0x67   : > { %271 = vrot.lane.b32.xlu1 %v1168_v6, %s932_s5  ;;  %269 = vrot.lane.b32.xlu0 %v1171_v7, %s932_s5  ;;  %v536_v59 = vadd.f32 %v535_v51, %v530_v55  ;;  %v260_v16 = vsel %vm259_vm0, 0.00013950893, %v934_v63 }
  0x68   : > { %v533_v60 = vadd.f32 %v532_v54, %v529_v56 }
  0x69   : > { %v1321_v27 = vmul.f32 %v536_v59, %v260_v16 }
  0x6b   : > { %298 = vrot.lane.b32.xlu1 %v1178_v8, %s932_s5  ;;  %290 = vrot.lane.b32.xlu0 %v1181_v9, %s932_s5 }
  0x6f   : > { %366 = vrot.lane.b32.xlu1 %v1158_v4, %s933_s20  ;;  %364 = vrot.lane.b32.xlu0 %v1161_v5, %s933_s20 }
  0x73   : > { %374 = vrot.lane.b32.xlu1 %v1168_v6, %s933_s20  ;;  %372 = vrot.lane.b32.xlu0 %v1171_v7, %s933_s20 }
  0x77   : > { %401 = vrot.lane.b32.xlu1 %v1178_v8, %s933_s20  ;;  %393 = vrot.lane.b32.xlu0 %v1181_v9, %s933_s20 }
  0x7b   : > { %273 = vrot.lane.b32.xlu1 %v1200_v10, %s932_s5  ;;  %265 = vrot.lane.b32.xlu0 %v1203_v11, %s932_s5 }
  0x7f   : > { %300 = vrot.lane.b32.xlu1 %v1210_v12, %s932_s5  ;;  %292 = vrot.lane.b32.xlu0 %v1213_v13, %s932_s5 }
  0x83   : > { %376 = vrot.lane.b32.xlu1 %v1200_v10, %s933_s20  ;;  %368 = vrot.lane.b32.xlu0 %v1203_v11, %s933_s20 }
  0x87   : > { %403 = vrot.lane.b32.xlu1 %v1210_v12, %s933_s20  ;;  %395 = vrot.lane.b32.xlu0 %v1213_v13, %s933_s20 }
  0x8b   : > { %275 = vrot.lane.b32.xlu1 %v1228_v14, %s932_s5  ;;  %267 = vrot.lane.b32.xlu0 %v1231_v15, %s932_s5 }
  0x8f   : > { %378 = vrot.lane.b32.xlu1 %v1228_v14, %s933_s20  ;;  %370 = vrot.lane.b32.xlu0 %v1231_v15, %s933_s20 }
  0xc5   : > { %v1249_v24 = vpop.permute.xlu1 %294  ;;  %v1251_v25 = vpop.permute.xlu0 %286 }
  0xc6   : > { %v302_v17 = vsel %vm277_vm1, %v1251_v25, %v1249_v24  ;;  %v306_v20 = vsel %vm277_vm1, %v1249_v24, %v1251_v25  ;;  %v1323_v24 = vmul.f32 %v533_v60, %v260_v16 }
  0xc7   : > { %v318_v25 = vsub.f32 %v302_v17, %v1133_v1  ;;  %v319_v28 = vsub.f32 %v306_v20, %v1130_v0 }
  0xc8   : > { %v569_v55 = vrot.slane %v1323_v24, 4 }
  0xc9   : > { %v1260_v36 = vpop.permute.xlu1 %296  ;;  %v1262_v37 = vpop.permute.xlu0 %288  ;;  %v334_v43 = vmul.f32 %v318_v25, %v318_v25 }
  0xca   : > { %v303_v21 = vsel %vm277_vm1, %v1262_v37, %v1260_v36  ;;  %v307_v22 = vsel %vm277_vm1, %v1260_v36, %v1262_v37 }
  0xcb   : > { %v320_v31 = vsub.f32 %v303_v21, %v1143_v3  ;;  %v342_v17 = vsub.f32 1.0, %v334_v43 }
  0xcd   : > { %v1273_v52 = vpop.permute.xlu1 %391  ;;  %v1275_v53 = vpop.permute.xlu0 %389  ;;  %v336_v46 = vmul.f32 %v320_v31, %v320_v31 }
  0xd1   : > { %v400_v18 = vpop.permute.xlu1 %399  ;;  %v1283_v19 = vpop.permute.xlu0 %397 }
  0xd2   : > { %v406_v23 = vsel %vm380_vm2, %v1273_v52, %v400_v18  ;;  %v410_v26 = vsel %vm380_vm2, %v400_v18, %v1273_v52  ;;  %v321_v52 = vsub.f32 %v307_v22, %v1140_v2  ;;  %v409_v40 = vsel %vm380_vm2, %v1283_v19, %v1275_v53 }
  0xd3   : > { %v423_v33 = vsub.f32 %v406_v23, %v1143_v3  ;;  %v424_v39 = vsub.f32 %v410_v26, %v1140_v2  ;;  %v422_v51 = vsub.f32 %v409_v40, %v1130_v0  ;;  %v344_v23 = vsub.f32 1.0, %v336_v46 }
  0xd5   : > { %v264_v34 = vpop.permute.xlu1 %263  ;;  %v262_v35 = vpop.permute.xlu0 %261  ;;  %v1353_v54 = vmul.f32 %v423_v33, %v423_v33 }
  0xd9   : > { %v272_v47 = vpop.permute.xlu1 %271  ;;  %v270_v48 = vpop.permute.xlu0 %269 }
  0xda   : > { %v279_v29 = vsel %vm277_vm1, %v264_v34, %v272_v47  ;;  %v283_v36 = vsel %vm277_vm1, %v272_v47, %v264_v34  ;;  %v278_v18 = vsel %vm277_vm1, %v262_v35, %v270_v48  ;;  %v282_v32 = vsel %vm277_vm1, %v270_v48, %v262_v35 }
  0xdb   : > { %v405_v34 = vsel %vm380_vm2, %v1275_v53, %v1283_v19  ;;  %v312_v41 = vsub.f32 %v279_v29, %v1158_v4  ;;  %v313_v42 = vsub.f32 %v283_v36, %v1168_v6  ;;  %v335_v35 = vmul.f32 %v319_v28, %v319_v28 }
  0xdc   : > { %v310_v3 = vsub.f32 %v278_v18, %v1161_v5  ;;  %v311_v2 = vsub.f32 %v282_v32, %v1171_v7  ;;  %v337_v47 = vmul.f32 %v321_v52, %v321_v52  ;;  %v421_v48 = vsub.f32 %v405_v34, %v1133_v1 }
  0xdd   : > { %v299_v57 = vpop.permute.xlu1 %298  ;;  %v291_v58 = vpop.permute.xlu0 %290  ;;  %v1355_v53 = vmul.f32 %v424_v39, %v424_v39  ;;  %v575_v19 = vrot.slane %v1321_v27, 4  ;;  %v328_v56 = vmul.f32 %v312_v41, %v312_v41  ;;  %v329_v59 = vmul.f32 %v313_v42, %v313_v42 }
  0xde   : > { %v304_v60 = vsel %vm277_vm1, %v291_v58, %v299_v57  ;;  %v308_v16 = vsel %vm277_vm1, %v299_v57, %v291_v58  ;;  %v343_v1 = vsub.f32 1.0, %v335_v35  ;;  %v326_v20 = vmul.f32 %v310_v3, %v310_v3 }
  0xdf   : > { %v327_v0 = vmul.f32 %v311_v2, %v311_v2  ;;  %v345_v26 = vsub.f32 1.0, %v337_v47  ;;  %v1363_v25 = vmul.f32 %v421_v48, %v421_v48  ;;  %v1365_v28 = vmul.f32 %v422_v51, %v422_v51 }
  0xe0   : > { %v322_v29 = vsub.f32 %v304_v60, %v1181_v9  ;;  %v323_v36 = vsub.f32 %v308_v16, %v1178_v8  ;;  %v447_v58 = vsub.f32 1.0, %v1353_v54  ;;  %v448_v52 = vsub.f32 1.0, %v1355_v53 }
  0xe1   : > { %v367_v61 = vpop.permute.xlu1 %366  ;;  %v1296_v62 = vpop.permute.xlu0 %364  ;;  %v352_v18 = vmul.f32 %v344_v23, %v328_v56  ;;  %v353_v32 = vmul.f32 %v345_v26, %v329_v59  ;;  %v350_v33 = vmul.f32 %v342_v17, %v326_v20  ;;  %v351_v39 = vmul.f32 %v343_v1, %v327_v0 }
  0xe2   : > { %v445_v3 = vsub.f32 1.0, %v1363_v25  ;;  %v446_v2 = vsub.f32 1.0, %v1365_v28  ;;  %v338_v46 = vmul.f32 %v322_v29, %v322_v29  ;;  %v339_v47 = vmul.f32 %v323_v36, %v323_v36 }
  0xe3   : > { %v358_v54 = vadd.f32 %v352_v18, %v350_v33  ;;  %v361_v53 = vadd.f32 %v353_v32, %v351_v39 }
  0xe4   : > { %v347_v0 = vsub.f32 1.0, %v339_v47 }
  0xe5   : > { %v375_v37 = vpop.permute.xlu1 %374  ;;  %v373_v30 = vpop.permute.xlu0 %372 }
  0xe6   : > { %v382_v31 = vsel %vm380_vm2, %v367_v61, %v375_v37  ;;  %v386_v57 = vsel %vm380_vm2, %v375_v37, %v367_v61  ;;  %v381_v37 = vsel %vm380_vm2, %v1296_v62, %v373_v30  ;;  %v385_v35 = vsel %vm380_vm2, %v373_v30, %v1296_v62 }
  0xe7   : > { %v415_v43 = vsub.f32 %v382_v31, %v1158_v4  ;;  %v416_v61 = vsub.f32 %v386_v57, %v1168_v6  ;;  %v413_v62 = vsub.f32 %v381_v37, %v1161_v5  ;;  %v414_v30 = vsub.f32 %v385_v35, %v1171_v7 }
  0xe8   : > { %v346_v7 = vsub.f32 1.0, %v338_v46 }
  0xe9   : > { %v402_v44 = vpop.permute.xlu1 %401  ;;  %v394_v45 = vpop.permute.xlu0 %393  ;;  %v431_v60 = vmul.f32 %v415_v43, %v415_v43  ;;  %v432_v16 = vmul.f32 %v416_v61, %v416_v61  ;;  %v429_v23 = vmul.f32 %v413_v62, %v413_v62  ;;  %v430_v26 = vmul.f32 %v414_v30, %v414_v30 }
  0xea   : > { %v407_v48 = vsel %vm380_vm2, %v394_v45, %v402_v44  ;;  %v411_v4 = vsel %vm380_vm2, %v402_v44, %v394_v45 }
  0xeb   : > { %v425_v45 = vsub.f32 %v407_v48, %v1181_v9  ;;  %v426_v1 = vsub.f32 %v411_v4, %v1178_v8  ;;  %v455_v18 = vmul.f32 %v447_v58, %v431_v60  ;;  %v456_v32 = vmul.f32 %v448_v52, %v432_v16 }
  0xec   : > { %v453_v43 = vmul.f32 %v445_v3, %v429_v23 }
  0xed   : > { %v274_v21 = vpop.permute.xlu1 %273  ;;  %v266_v22 = vpop.permute.xlu0 %265  ;;  %v441_v33 = vmul.f32 %v425_v45, %v425_v45  ;;  %v442_v39 = vmul.f32 %v426_v1, %v426_v1 }
  0xee   : > { %v280_v34 = vsel %vm277_vm1, %v266_v22, %v274_v21  ;;  %v284_v40 = vsel %vm277_vm1, %v274_v21, %v266_v22 }
  0xef   : > { %v314_v6 = vsub.f32 %v280_v34, %v1203_v11  ;;  %v315_v51 = vsub.f32 %v284_v40, %v1200_v10  ;;  %v449_v48 = vsub.f32 1.0, %v441_v33  ;;  %v450_v4 = vsub.f32 1.0, %v442_v39 }
  0xf1   : > { %v301_v41 = vpop.permute.xlu1 %300  ;;  %v293_v42 = vpop.permute.xlu0 %292  ;;  %v330_v21 = vmul.f32 %v314_v6, %v314_v6  ;;  %v331_v22 = vmul.f32 %v315_v51, %v315_v51 }
  0xf2   : > { %v305_v17 = vsel %vm277_vm1, %v293_v42, %v301_v41  ;;  %v309_v44 = vsel %vm277_vm1, %v301_v41, %v293_v42 }
  0xf3   : > { %v324_v25 = vsub.f32 %v305_v17, %v1213_v13  ;;  %v325_v28 = vsub.f32 %v309_v44, %v1210_v12  ;;  %v354_v34 = vmul.f32 %v346_v7, %v330_v21  ;;  %v355_v40 = vmul.f32 %v347_v0, %v331_v22 }
  0xf4   : > { %v461_v7 = vadd.f32 %v455_v18, %v453_v43  ;;  %v224_v18 = vadd.s32 128, %v1291_v50 }
  0xf5   : > { %v377_v56 = vpop.permute.xlu1 %376  ;;  %v369_v59 = vpop.permute.xlu0 %368  ;;  %v340_v61 = vmul.f32 %v324_v25, %v324_v25  ;;  %v359_v3 = vadd.f32 %v358_v54, %v354_v34 }
  0xf6   : > { %v383_v20 = vsel %vm380_vm2, %v369_v59, %v377_v56  ;;  %v387_v5 = vsel %vm380_vm2, %v377_v56, %v369_v59  ;;  %vm254_vm5 = vcmp.lt.s32.totalorder %v224_v18, 240 }
  0xf7   : > { %v417_v8 = vsub.f32 %v383_v20, %v1203_v11  ;;  %v418_v36 = vsub.f32 %v387_v5, %v1200_v10  ;;  %v454_v11 = vmul.f32 %v446_v2, %v430_v26  ;;  %v341_v10 = vmul.f32 %v325_v28, %v325_v28 }
  0xf8   : > { %v362_v2 = vadd.f32 %v361_v53, %v355_v40  ;;  %v348_v62 = vsub.f32 1.0, %v340_v61  ;;  %v236_v61 = vand.u32 15, %v224_v18 }
  0xf9   : > { %v404_v29 = vpop.permute.xlu1 %403  ;;  %v396_v9 = vpop.permute.xlu0 %395  ;;  %v433_v46 = vmul.f32 %v417_v8, %v417_v8  ;;  %v434_v47 = vmul.f32 %v418_v36, %v418_v36  ;;  %v349_v30 = vsub.f32 1.0, %v341_v10  ;;  %v464_v0 = vadd.f32 %v456_v32, %v454_v11 }
  0xfa   : > { %v408_v31 = vsel %vm380_vm2, %v396_v9, %v404_v29  ;;  %v412_v57 = vsel %vm380_vm2, %v404_v29, %v396_v9  ;;  %v576_v8 = vadd.f32 %v575_v19, %v1321_v27  ;;  %v229_v19 = vand.u32 15, %v1291_v50 }
  0xfb   : > { %v427_v41 = vsub.f32 %v408_v31, %v1213_v13  ;;  %v428_v42 = vsub.f32 %v412_v57, %v1210_v12  ;;  %v457_v17 = vmul.f32 %v449_v48, %v433_v46  ;;  %v458_v44 = vmul.f32 %v450_v4, %v434_v47 }
  0xfc   : > { %v577_v40 = vrot.slane %v576_v8, 2  ;;  %vm249_vm3 = vcmp.lt.s32.totalorder %v229_v19, 15  ;;  %vm250_vm4 = vcmp.lt.s32.totalorder %v236_v61, 15 }
  0xfd   : > { %v276_v37 = vpop.permute.xlu1 %275  ;;  %v268_v35 = vpop.permute.xlu0 %267  ;;  %v443_v6 = vmul.f32 %v427_v41, %v427_v41  ;;  %v444_v51 = vmul.f32 %v428_v42, %v428_v42  ;;  %v462_v29 = vadd.f32 %v461_v7, %v457_v17  ;;  %v465_v9 = vadd.f32 %v464_v0, %v458_v44 }
  0xfe   : > { %v281_v58 = vsel %vm277_vm1, %v268_v35, %v276_v37  ;;  %v285_v52 = vsel %vm277_vm1, %v276_v37, %v268_v35  ;;  %v578_v35 = vadd.f32 %v577_v40, %v576_v8 }
  0xff   : > { %v316_v13 = vsub.f32 %v281_v58, %v1231_v15  ;;  %v317_v12 = vsub.f32 %v285_v52, %v1228_v14  ;;  %v451_v21 = vsub.f32 1.0, %v443_v6  ;;  %v452_v22 = vsub.f32 1.0, %v444_v51 }
 0x101   : > { %v332_v56 = vmul.f32 %v316_v13, %v316_v13  ;;  %v333_v59 = vmul.f32 %v317_v12, %v317_v12  ;;  %v379_v60 = vpop.permute.xlu1 %378  ;;  %v371_v16 = vpop.permute.xlu0 %370  ;;  %v579_v12 = vrot.slane %v578_v35, 1 }
 0x102   : > { %v384_v45 = vsel %vm380_vm2, %v371_v16, %v379_v60  ;;  %v388_v1 = vsel %vm380_vm2, %v379_v60, %v371_v16  ;;  %v256_v60 = vsel %vm254_vm5, 0.00013020834, %v934_v63 }
 0x103   : > { %v356_v20 = vmul.f32 %v348_v62, %v332_v56  ;;  %v357_v5 = vmul.f32 %v349_v30, %v333_v59  ;;  %v419_v54 = vsub.f32 %v384_v45, %v1231_v15  ;;  %v420_v53 = vsub.f32 %v388_v1, %v1228_v14 }
 0x104   : > { %v570_v15 = vadd.f32 %v569_v55, %v1323_v24  ;;  %v251_v56 = vsel %vm249_vm3, 0.00013020834, %v934_v63  ;;  %v252_v59 = vsel %vm250_vm4, 0.00013020834, %v934_v63  ;;  %v580_v44 = vadd.f32 %v579_v12, %v578_v35 }
 0x105   : > { %v360_v23 = vadd.f32 %v359_v3, %v356_v20  ;;  %v363_v26 = vadd.f32 %v362_v2, %v357_v5  ;;  %v435_v25 = vmul.f32 %v419_v54, %v419_v54  ;;  %v436_v28 = vmul.f32 %v420_v53, %v420_v53 }
 0x106   : > { %v571_v41 = vrot.slane %v570_v15, 2  ;;  %v935_v2 = vmov 1966171168  }
 0x107   : > { %v537_v36 = vrot.slane %v360_v23, 4  ;;  %v543_v14 = vrot.slane %v363_v26, 4  ;;  %v459_v31 = vmul.f32 %v451_v21, %v435_v25  ;;  %v460_v57 = vmul.f32 %v452_v22, %v436_v28 }
 0x108   : > { %v572_v46 = vadd.f32 %v571_v41, %v570_v15  ;;  %v587_v50 = vunpack.c.l.s4 %v935_v2 }
 0x109   : > { %v538_v32 = vadd.f32 %v537_v36, %v360_v23  ;;  %v544_v33 = vadd.f32 %v543_v14, %v363_v26  ;;  %v463_v39 = vadd.f32 %v462_v29, %v459_v31  ;;  %v466_v34 = vadd.f32 %v465_v9, %v460_v57 }
 0x10a   : > { %v573_v3 = vrot.slane %v572_v46, 1  ;;  %v588_v1 = vunpack.c.0.s8 %v587_v50 }
 0x10b   : > { %v539_v42 = vrot.slane %v538_v32, 2  ;;  %v545_v43 = vrot.slane %v544_v33, 2  ;;  %v551_v11 = vrot.slane %v463_v39, 4  ;;  %v557_v27 = vrot.slane %v466_v34, 4 }
 0x10c   : > { %v574_v45 = vadd.f32 %v573_v3, %v572_v46  ;;  %v591_v23 = vsub.s32 %v588_v1, %v1288_v49 }
 0x10d   : > { %v540_v24 = vadd.f32 %v539_v42, %v538_v32  ;;  %v546_v55 = vadd.f32 %v545_v43, %v544_v33  ;;  %v552_v10 = vadd.f32 %v551_v11, %v463_v39  ;;  %v558_v37 = vadd.f32 %v557_v27, %v466_v34 }
 0x10f   : > { %v541_v47 = vrot.slane %v540_v24, 1  ;;  %v547_v58 = vrot.slane %v546_v55, 1  ;;  %v553_v52 = vrot.slane %v552_v10, 2  ;;  %v559_v48 = vrot.slane %v558_v37, 2 }
 0x111   : > { %v554_v4 = vadd.f32 %v553_v52, %v552_v10  ;;  %v560_v13 = vadd.f32 %v559_v48, %v558_v37  ;;  %v542_v6 = vadd.f32 %v541_v47, %v540_v24  ;;  %v548_v51 = vadd.f32 %v547_v58, %v546_v55 }
 0x113   : > { %v555_v62 = vrot.slane %v554_v4, 1  ;;  %v561_v30 = vrot.slane %v560_v13, 1  ;;  %v549_v20 = vmul.f32 %v542_v6, %v251_v56  ;;  %v550_v5 = vmul.f32 %v548_v51, %v252_v59 }
 0x115   : > { %v556_v16 = vadd.f32 %v555_v62, %v554_v4  ;;  %v562_v17 = vadd.f32 %v561_v30, %v560_v13 }
 0x117   : > { %v563_v54 = vmul.f32 0.00013020834, %v556_v16  ;;  %v564_v53 = vmul.f32 %v562_v17, %v256_v60 }
 0x119   : > { %v565_v7 = vadd.f32 %v563_v54, %v549_v20  ;;  %v566_v0 = vadd.f32 %v564_v53, %v550_v5 }
 0x11b   : > { %v581_v21 = vadd.f32 %v574_v45, %v565_v7  ;;  %v582_v22 = vadd.f32 %v580_v44, %v566_v0 }
 0x11d   : > { %v585_v63 = vcombine.low %v581_v21, %v582_v22 }
 0x11f   : > { %v592_v26 = vrot.slane %v585_v63, %v591_v23 }
 0x121   : > { %v599_v25 = vrot.slane %v592_v26, %v591_v23 }
 0x123   : > { %605 = vst.msk [vmem:[%s203_s17] sm:$0x3] %vm603_vm6, %v599_v25 }
 0x124   : > { %869 = shalt.err (!%p866_p11)
}
 0x125   : > { %s870_s30 = scalar_lea.hbm %s1447_s27, 32  ;;  %s874_s3 = scalar_lea.hbm %s1493_s2, 64 }
 0x126   : > { %p871_p3 = scmp.ne.s32.totalorder %s1447_s27, %s870_s30  ;;  %p875_p2 = scmp.lt.u32.totalorder %s1447_s27, %s1493_s2 }
 0x127   : > { %p876_p4 = scmp.lt.u32.totalorder %s874_s3, %s870_s30  ;;  %p878_p13 = scmp.lt.u32.totalorder %s870_s30, %s1447_s27 }
 0x128   : > { %p872_p8 = pnand %p871_p3, %p1503_p1 }
 0x129   : > { %p877_p6 = por %p876_p4, %p875_p2 }
 0x12a   : > { %p873_p0 = pneg %p872_p8 }
 0x12b   : > { %p879_p12 = por %p878_p13, %p877_p6 }
 0x12d   : > { %p880_p10 = pnand %p879_p12, %p873_p0 }
 0x12f   : > { %883 = shalt.err (!%p880_p10)
}
 0x130   : > { %743 = dma.vmem_to_hbm [thread:$0]  (%p1503_p1), %s1449_s28, 32, %s1447_s27, %s607_s25  }
 0x131 PF: > { %s633_s5 = sand.u32 1, %s914_s9   ;;  %p1504_p5 = scmp.ne.s32.totalorder %s1499_s22, 0 }
 0x132   : > { %p1505_p7 = scmp.ge.s32.totalorder %s926_s12, 2  ;;  %s634_s20 = scalar_lea.sflag [#allocation4], %s633_s5 }
 0x134   : > { %p753_p9 = pnand %p1505_p7, %p1504_p5 }
 0x136   : > { %909 = dma.done.wait (!%p753_p9), %s634_s20, 32  }
 0x137   : > { %911 = vsyncadd (!%p753_p9), %s634_s20, 4294967264  ;;  %p18_p11 = scmp.ge.s32.totalorder %s977_s15, 4   ;;  %s1506_s9 = smov %s918_s10 }
 0x138   : > { %s1507_s10 = smov %s922_s11  ;;  %s1508_s11 = smov %s989_s18 }
 0x139   : > { %s1509_s12 = smov %s977_s15  ;;  %20 = sbr.rel (!%p18_p11) target bundleno = 7 (0x7), region = 86 }
 0x140   :  { %639 = vsyncpa [#allocation3], 1 }
 0x141   :  { %641 = vsyncpa [#allocation3 + $0x1], 1 }
 0x142   :  { %642 = vsyncpa [#allocation6], 1 }
 0x143   :  { %644 = vsyncpa [#allocation6 + $0x1], 1 }
 0x144   :  { %645 = vsyncpa [#allocation4], 1 }
 0x145   :  { %647 = vsyncpa [#allocation4 + $0x1], 1 }

</bundles_post_ra>
